<compile_context>
chip_gen: v6e
topology: v6e:2x2x1
jax: 0.10.0
libtpu: 0.0.40
codegen_flags: <defaults>
</compile_context>

<pallas_src>
import jax
import jax.numpy as jnp
from jax import lax
from jax.experimental import pallas as pl
from jax.experimental.pallas import tpu as pltpu

_CHUNK = 256          # lane-axis sub-tile processed fully in vregs
_MAX_TILE_B = 2048    # max batch rows (lanes) per grid step


def _round_up(x, m):
    return ((x + m - 1) // m) * m


def _critic_kernel(x_ref, w1_ref, b1_ref, w2_ref, b2_ref, w3_ref, b3_ref, o_ref):
    # x_ref: (obs, TILE_B) feature-major, lane-dense (batch on the 128-lane axis).
    w1 = w1_ref[...]            # (64, obs)
    b1 = b1_ref[...]            # (64, 1)
    w2 = w2_ref[...]            # (32, 64)
    b2 = b2_ref[...]            # (32, 1)
    w3 = w3_ref[...]            # (1, 32)
    b3 = b3_ref[0]              # scalar (SMEM)

    n_chunks = x_ref.shape[1] // _CHUNK  # static

    def body(c, carry):
        off = pl.multiple_of(c * _CHUNK, _CHUNK)
        x = x_ref[:, pl.ds(off, _CHUNK)]                                # (obs, C)
        h1 = jnp.dot(w1, x, preferred_element_type=jnp.float32) + b1   # (64, C)
        h1 = jnp.maximum(h1, 0.0)
        h2 = jnp.dot(w2, h1, preferred_element_type=jnp.float32) + b2  # (32, C)
        h2 = jnp.maximum(h2, 0.0)
        v = jnp.dot(w3, h2, preferred_element_type=jnp.float32) + b3   # (1, C)
        o_ref[:, pl.ds(off, _CHUNK)] = v.astype(o_ref.dtype)
        return carry

    # Unrolled so the three back-to-back matmuls per chunk stay visible to the
    # LLO scheduler and all intermediates stay in vregs.
    lax.fori_loop(0, n_chunks, body, None, unroll=True)


@jax.jit
def critic_forward(state, w1, b1, w2, b2, w3, b3):
    """relu(state@w1+b1) -> relu(@w2+b2) -> @w3+b3, returned as (B, 1)."""
    B, obs = state.shape
    d1 = w1.shape[1]
    d2 = w2.shape[1]

    # Adaptive batch tile: small pad waste, and >=2 grid steps whenever there
    # is enough work so both TensorCores get used on v7x ("parallel" axis).
    num_tiles = max(-(-B // _MAX_TILE_B), 1)
    if B >= 2 * _CHUNK:
        num_tiles = max(num_tiles, 2)
    tile_b = _round_up(-(-B // num_tiles), _CHUNK)
    grid_steps = -(-B // tile_b)
    b_pad = grid_steps * tile_b

    # Feature-major, lane-dense state. Transpose + (tiny, adaptive) pad fuse
    # into a single XLA copy pass; padded rows are zeros and their outputs are
    # sliced away below.
    x_t = jnp.pad(state.T, ((0, 0), (0, b_pad - B)))      # (obs, b_pad)

    # Weights as (out_features, in_features); biases as column vectors so they
    # broadcast over the batch/lane axis. Final bias is a plain scalar (SMEM).
    w1_t = w1.T                       # (d1, obs)
    w2_t = w2.T                       # (d2, d1)
    w3_t = w3.T                       # (1, d2)
    b1_c = b1.reshape(d1, 1)
    b2_c = b2.reshape(d2, 1)
    b3_s = b3.reshape((1,))

    out = pl.pallas_call(
        _critic_kernel,
        out_shape=jax.ShapeDtypeStruct((1, b_pad), jnp.float32),
        grid_spec=pltpu.PrefetchScalarGridSpec(
            num_scalar_prefetch=0,
            grid=(grid_steps,),
            in_specs=[
                # Streamed per grid step (double-buffered by the pipeline),
                # lane-dense: no 16->128 lane padding, no per-step relayout.
                pl.BlockSpec((obs, tile_b), lambda i: (0, i)),
                # VMEM-resident parameters (constant index maps -> no re-fetch).
                pl.BlockSpec((d1, obs), lambda i: (0, 0)),
                pl.BlockSpec((d1, 1), lambda i: (0, 0)),
                pl.BlockSpec((d2, d1), lambda i: (0, 0)),
                pl.BlockSpec((d2, 1), lambda i: (0, 0)),
                pl.BlockSpec((1, d2), lambda i: (0, 0)),
                # Scalar final bias in SMEM.
                pl.BlockSpec(memory_space=pltpu.SMEM),
            ],
            # Lane-dense (1, TILE_B) output slab -> unmasked vector stores.
            out_specs=pl.BlockSpec((1, tile_b), lambda i: (0, i)),
        ),
        compiler_params=pltpu.CompilerParams(
            dimension_semantics=("parallel",),     # megacore sharding on v7x
            vmem_limit_bytes=32 * 1024 * 1024,     # explicit; safe on v5e/v6e/v7x
        ),
    )(x_t, w1_t, b1_c, w2_t, b2_c, w3_t, b3_s)

    # (1, b_pad) lane-dense slab -> (B, 1) to match the torch Critic output.
    return out[0, :B].reshape(B, 1)


def _init_linear(key, fan_in, fan_out):
    # Mimic torch.nn.Linear default init: U(-1/sqrt(fan_in), 1/sqrt(fan_in)).
    kw, kb = jax.random.split(key)
    bound = 1.0 / (fan_in ** 0.5)
    w = jax.random.uniform(kw, (fan_in, fan_out), jnp.float32, -bound, bound)
    b = jax.random.uniform(kb, (1, fan_out), jnp.float32, -bound, bound)
    return w, b


def _reference(state, w1, b1, w2, b2, w3, b3):
    h1 = jnp.maximum(state @ w1 + b1, 0.0)
    h2 = jnp.maximum(h1 @ w2 + b2, 0.0)
    return h2 @ w3 + b3


if __name__ == "__main__":
    observation_space = 16
    hiddens = [64, 32]

    key = jax.random.PRNGKey(0)
    k_x, k1, k2, k3, k_x2 = jax.random.split(key, 5)

    w1, b1 = _init_linear(k1, observation_space, hiddens[0])
    w2, b2 = _init_linear(k2, hiddens[0], hiddens[1])
    w3, b3 = _init_linear(k3, hiddens[1], 1)

    # Small-batch check (batch=2), matching the module spec.
    batch = 2
    state = jax.random.normal(k_x, (batch, observation_space), jnp.float32)
    v = jax.block_until_ready(critic_forward(state, w1, b1, w2, b2, w3, b3))
    v_ref = _reference(state, w1, b1, w2, b2, w3, b3)
    assert v.shape == (batch, 1)
    assert jnp.allclose(v, v_ref, atol=1e-5, rtol=1e-5)

    # Exercise the multi-step grid + adaptive tiling path (2500 -> tile 1280).
    batch2 = 2500
    state2 = jax.random.normal(k_x2, (batch2, observation_space), jnp.float32)
    v2 = jax.block_until_ready(critic_forward(state2, w1, b1, w2, b2, w3, b3))
    v2_ref = _reference(state2, w1, b1, w2, b2, w3, b3)
    assert v2.shape == (batch2, 1)
    assert jnp.allclose(v2, v2_ref, atol=1e-5, rtol=1e-5)

    print("KERNEL_OK")
</pallas_src>

<mosaic_0001>
module attributes {stable_mosaic.version = 11 : i64} {
  func.func @_critic_kernel(%arg0: i32, %arg1: memref<16x256xf32, #tpu.memory_space<vmem>>, %arg2: memref<64x16xf32, #tpu.memory_space<vmem>>, %arg3: memref<64x1xf32, #tpu.memory_space<vmem>>, %arg4: memref<32x64xf32, #tpu.memory_space<vmem>>, %arg5: memref<32x1xf32, #tpu.memory_space<vmem>>, %arg6: memref<1x32xf32, #tpu.memory_space<vmem>>, %arg7: memref<1xf32, #tpu.memory_space<smem>>, %arg8: memref<1x256xf32, #tpu.memory_space<vmem>>) attributes {dimension_semantics = [#tpu.dimension_semantics<parallel>], iteration_bounds = array<i64: 1>, scalar_prefetch = 0 : i64, scratch_operands = 0 : i64, tpu.core_type = #tpu.core_type<tc>, window_params = [{transform_indices = @transform_0, window_bounds = array<i64: 16, 256>}, {pipeline_mode = #tpu.pipeline_mode<synchronous>, transform_indices = @transform_1, window_bounds = array<i64: 64, 16>}, {pipeline_mode = #tpu.pipeline_mode<synchronous>, transform_indices = @transform_2, window_bounds = array<i64: 64, 1>}, {pipeline_mode = #tpu.pipeline_mode<synchronous>, transform_indices = @transform_3, window_bounds = array<i64: 32, 64>}, {pipeline_mode = #tpu.pipeline_mode<synchronous>, transform_indices = @transform_4, window_bounds = array<i64: 32, 1>}, {pipeline_mode = #tpu.pipeline_mode<synchronous>, transform_indices = @transform_5, window_bounds = array<i64: 1, 32>}, {transform_indices = @transform_6, window_bounds = array<i64: 1>}, {transform_indices = @transform_7, window_bounds = array<i64: 1, 256>}]} {
    %c0 = arith.constant 0 : index
    %c0_0 = arith.constant 0 : index
    %0 = vector.load %arg2[%c0, %c0_0] : memref<64x16xf32, #tpu.memory_space<vmem>>, vector<64x16xf32>
    %c0_1 = arith.constant 0 : index
    %c0_2 = arith.constant 0 : index
    %1 = vector.load %arg3[%c0_1, %c0_2] : memref<64x1xf32, #tpu.memory_space<vmem>>, vector<64x1xf32>
    %c0_3 = arith.constant 0 : index
    %c0_4 = arith.constant 0 : index
    %2 = vector.load %arg4[%c0_3, %c0_4] : memref<32x64xf32, #tpu.memory_space<vmem>>, vector<32x64xf32>
    %c0_5 = arith.constant 0 : index
    %c0_6 = arith.constant 0 : index
    %3 = vector.load %arg5[%c0_5, %c0_6] : memref<32x1xf32, #tpu.memory_space<vmem>>, vector<32x1xf32>
    %c0_7 = arith.constant 0 : index
    %c0_8 = arith.constant 0 : index
    %4 = vector.load %arg6[%c0_7, %c0_8] : memref<1x32xf32, #tpu.memory_space<vmem>>, vector<1x32xf32>
    %c0_9 = arith.constant 0 : index
    %5 = memref.load %arg7[%c0_9] : memref<1xf32, #tpu.memory_space<smem>>
    %c0_i32 = arith.constant 0 : i32
    %c256_i32 = arith.constant 256 : i32
    %6 = arith.muli %c0_i32, %c256_i32 : i32
    %7 = tpu.assume_multiple %6, 256 : i32
    %c0_10 = arith.constant 0 : index
    %8 = arith.index_cast %7 : i32 to index
    %9 = vector.load %arg1[%c0_10, %8] : memref<16x256xf32, #tpu.memory_space<vmem>>, vector<16x256xf32>
    %cst = arith.constant dense<0.000000e+00> : vector<64x256xf32>
    %10 = tpu.matmul %0, %9, %cst {dimension_numbers = #tpu.dot_dimension_numbers<[1], [0], [0], [1], [0, 0, 1, 1], [], []>} : vector<64x16xf32>, vector<16x256xf32>, vector<64x256xf32> -> vector<64x256xf32>
    %11 = vector.broadcast %1 : vector<64x1xf32> to vector<64x256xf32>
    %12 = arith.addf %10, %11 : vector<64x256xf32>
    %cst_11 = arith.constant 0.000000e+00 : f32
    %13 = vector.broadcast %cst_11 : f32 to vector<64x256xf32>
    %14 = arith.maximumf %12, %13 : vector<64x256xf32>
    %cst_12 = arith.constant dense<0.000000e+00> : vector<32x256xf32>
    %15 = tpu.matmul %2, %14, %cst_12 {dimension_numbers = #tpu.dot_dimension_numbers<[1], [0], [0], [1], [0, 0, 1, 1], [], []>} : vector<32x64xf32>, vector<64x256xf32>, vector<32x256xf32> -> vector<32x256xf32>
    %16 = vector.broadcast %3 : vector<32x1xf32> to vector<32x256xf32>
    %17 = arith.addf %15, %16 : vector<32x256xf32>
    %cst_13 = arith.constant 0.000000e+00 : f32
    %18 = vector.broadcast %cst_13 : f32 to vector<32x256xf32>
    %19 = arith.maximumf %17, %18 : vector<32x256xf32>
    %cst_14 = arith.constant dense<0.000000e+00> : vector<1x256xf32>
    %20 = tpu.matmul %4, %19, %cst_14 {dimension_numbers = #tpu.dot_dimension_numbers<[1], [0], [0], [1], [0, 0, 1, 1], [], []>} : vector<1x32xf32>, vector<32x256xf32>, vector<1x256xf32> -> vector<1x256xf32>
    %21 = vector.broadcast %5 : f32 to vector<1x256xf32>
    %22 = arith.addf %20, %21 : vector<1x256xf32>
    %c0_15 = arith.constant 0 : index
    %23 = arith.index_cast %7 : i32 to index
    %24 = vector.load %arg8[%c0_15, %23] : memref<1x256xf32, #tpu.memory_space<vmem>>, vector<1x256xf32>
    tpu.vector_store %arg8[%c0_15, %23], %22 {strides = array<i32>} : memref<1x256xf32, #tpu.memory_space<vmem>>, vector<1x256xf32>,
    %c1_i32 = arith.constant 1 : i32
    return
  }
  func.func @transform_0(%arg0: i32) -> (i32, i32) {
    %c0_i32 = arith.constant 0 : i32
    %c0_i32_0 = arith.constant 0 : i32
    return %c0_i32, %arg0 : i32, i32
  }
  func.func @transform_1(%arg0: i32) -> (i32, i32) {
    %c0_i32 = arith.constant 0 : i32
    %c0_i32_0 = arith.constant 0 : i32
    %c0_i32_1 = arith.constant 0 : i32
    return %c0_i32, %c0_i32_0 : i32, i32
  }
  func.func @transform_2(%arg0: i32) -> (i32, i32) {
    %c0_i32 = arith.constant 0 : i32
    %c0_i32_0 = arith.constant 0 : i32
    %c0_i32_1 = arith.constant 0 : i32
    return %c0_i32, %c0_i32_0 : i32, i32
  }
  func.func @transform_3(%arg0: i32) -> (i32, i32) {
    %c0_i32 = arith.constant 0 : i32
    %c0_i32_0 = arith.constant 0 : i32
    %c0_i32_1 = arith.constant 0 : i32
    return %c0_i32, %c0_i32_0 : i32, i32
  }
  func.func @transform_4(%arg0: i32) -> (i32, i32) {
    %c0_i32 = arith.constant 0 : i32
    %c0_i32_0 = arith.constant 0 : i32
    %c0_i32_1 = arith.constant 0 : i32
    return %c0_i32, %c0_i32_0 : i32, i32
  }
  func.func @transform_5(%arg0: i32) -> (i32, i32) {
    %c0_i32 = arith.constant 0 : i32
    %c0_i32_0 = arith.constant 0 : i32
    %c0_i32_1 = arith.constant 0 : i32
    return %c0_i32, %c0_i32_0 : i32, i32
  }
  func.func @transform_6(%arg0: i32) -> i32 {
    %c0_i32 = arith.constant 0 : i32
    %c0_i32_0 = arith.constant 0 : i32
    return %c0_i32 : i32
  }
  func.func @transform_7(%arg0: i32) -> (i32, i32) {
    %c0_i32 = arith.constant 0 : i32
    %c0_i32_0 = arith.constant 0 : i32
    return %c0_i32, %arg0 : i32, i32
  }
}

</mosaic_0001>

<bundles_post_ra>
// kernel: critic_forward.1
= control target key start
LH: loop header
LB: loop body
LE: loop exit
PB: predicated region body
PF: predicated region fallthrough
CT: control target
= control target key end

     0   :  { %v502_v3 = vmov 0.0   ;;  %v503_v4 = vmov 0   ;;  %vm97_vm0 = vcmask 130048   ;;  %vm271_vm1 = vcmask 523264   ;;  %s659_s0 = inlined_call_operand.vmem [shape: f32[16,256], index: 0, kind: input, shape index: {}]   ;;  %s660_s1 = inlined_call_operand.vmem [shape: f32[64,16], index: 1, kind: input, shape index: {}]   ;;  %s661_s2 = inlined_call_operand.vmem [shape: f32[64,1], index: 2, kind: input, shape index: {}]   ;;  %s662_s4 = inlined_call_operand.vmem [shape: f32[32,1], index: 4, kind: input, shape index: {}]   ;;  %s663_s3 = inlined_call_operand.vmem [shape: f32[32,64], index: 3, kind: input, shape index: {}]   ;;  %s664_s5 = inlined_call_operand.vmem [shape: f32[1,32], index: 5, kind: input, shape index: {}]   ;;  %s665_s6 = inlined_call_operand.<no memory space> [shape: f32[1], index: 6, kind: input, shape index: {}]   ;;  %s666_s7 = inlined_call_operand.vmem [shape: f32[1,256], index: 7, kind: output, shape index: {}]  }
   0x1   :  { %v56_v0 = vld [vmem:[%s659_s0 + $0x18] sm:$0xff]  ;;  %v55_v1 = vld [vmem:[%s659_s0 + $0x10] sm:$0xff]  ;;  %v54_v2 = vld [vmem:[%s659_s0 + $0x8] sm:$0xff]  ;;  %186 = vmatprep.mubr.f32.mxu0 %v502_v3  ;;  %501 = vset.pattern.permute.xlu1 %v503_v4  ;;  %vm382_vm2 = vcmask 261120  }
   0x2   :  { %150 = vmatprep.subr.mxu0 %v56_v0  ;;  %v53_v5 = vld [vmem:[%s659_s0] sm:$0xff]  ;;  %500 = vset.pattern.permute.xlu0 %v503_v4  ;;  %v40_v7 = vld [vmem:[%s661_s2 + $0x28] sm:$0xff]  ;;  %v42_v8 = vld [vmem:[%s661_s2 + $0x38] sm:$0xff] }
   0x3   :  { %151 = vmatpush1.msra.mxu0 %v55_v1  ;;  %v27_v6 = vld [vmem:[%s660_s1] sm:$0xff]  ;;  %348 = vmatprep.mubr.f32.mxu1 %v502_v3  ;;  %v28_v9 = vld [vmem:[%s660_s1 + $0x8] sm:$0xff]  ;;  %v41_v11 = vld [vmem:[%s661_s2 + $0x30] sm:$0xff] }
   0x4   :  { %152 = vmatprep.subr.mxu0 %v54_v2  ;;  %84 = vperm.xlu1 %501, %v40_v7   ;;  %v39_v10 = vld [vmem:[%s661_s2 + $0x20] sm:$0xff]  ;;  %v29_v12 = vld [vmem:[%s660_s1 + $0x10] sm:$0xff]  ;;  %v38_v14 = vld [vmem:[%s661_s2 + $0x18] sm:$0xff] }
   0x5   :  { %153 = vmatpush1.msra.mxu0 %v53_v5  ;;  %94 = vperm.xlu0 %500, %v42_v8   ;;  %v37_v13 = vld [vmem:[%s661_s2 + $0x10] sm:$0xff]  ;;  %v30_v15 = vld [vmem:[%s660_s1 + $0x18] sm:$0xff]  ;;  %v35_v16 = vld [vmem:[%s661_s2] sm:$0xff] }
   0x6   :  { %484 = vmatmul.mubr.msk.f32.vlgmr.msra.gmra.mxu0 %vm97_vm0, %v27_v6  ;;  %v36_v17 = vld [vmem:[%s661_s2 + $0x8] sm:$0xff]  ;;  %v31_v18 = vld [vmem:[%s660_s1 + $0x20] sm:$0xff]  ;;  %v49_v19 = vld [vmem:[%s662_s4 + $0x10] sm:$0xff] }
   0x7   :  { %192 = vmatprep.mubr.f32.mxu0 %v502_v3  ;;  %v50_v20 = vld [vmem:[%s662_s4 + $0x18] sm:$0xff]  ;;  %v32_v21 = vld [vmem:[%s660_s1 + $0x28] sm:$0xff]  ;;  %v47_v22 = vld [vmem:[%s662_s4] sm:$0xff] }
   0x8   :  { %79 = vperm.xlu1 %501, %v39_v10   ;;  %v48_v23 = vld [vmem:[%s662_s4 + $0x8] sm:$0xff]  ;;  %v33_v24 = vld [vmem:[%s660_s1 + $0x30] sm:$0xff]  ;;  %v34_v25 = vld [vmem:[%s660_s1 + $0x38] sm:$0xff] }
   0x9   :  { %89 = vperm.xlu0 %500, %v41_v11  }
   0xa   :  { %485 = vmatmul.mubr.msk.f32.gmra.mxu0 %vm97_vm0, %v28_v9 }
   0xb   :  { %198 = vmatprep.mubr.f32.mxu0 %v502_v3 }
   0xc   :  { %69 = vperm.xlu1 %501, %v37_v13  }
   0xd   :  { %74 = vperm.xlu0 %500, %v38_v14  }
   0xe   :  { %486 = vmatmul.mubr.msk.f32.gmra.mxu0 %vm97_vm0, %v29_v12 }
   0xf   :  { %204 = vmatprep.mubr.f32.mxu0 %v502_v3 }
  0x10   :  { %59 = vperm.xlu1 %501, %v35_v16  }
  0x11   :  { %64 = vperm.xlu0 %500, %v36_v17  }
  0x12   :  { %487 = vmatmul.mubr.msk.f32.gmra.mxu0 %vm97_vm0, %v30_v15 }
  0x13   :  { %210 = vmatprep.mubr.f32.mxu0 %v502_v3 }
  0x14   :  { %263 = vperm.xlu1 %501, %v49_v19   ;;  %v43_v19 = vld [vmem:[%s663_s3] sm:$0xff] }
  0x15   :  { %268 = vperm.xlu0 %500, %v50_v20   ;;  %v44_v20 = vld [vmem:[%s663_s3 + $0x8] sm:$0xff] }
  0x16   :  { %488 = vmatmul.mubr.msk.f32.gmra.mxu0 %vm97_vm0, %v31_v18 }
  0x17   :  { %216 = vmatprep.mubr.f32.mxu0 %v502_v3 }
  0x18   :  { %253 = vperm.xlu1 %501, %v47_v22   ;;  %v46_v22 = vld [vmem:[%s663_s3 + $0x18] sm:$0xff] }
  0x19   :  { %258 = vperm.xlu0 %500, %v48_v23  }
  0x1a   :  { %489 = vmatmul.mubr.msk.f32.gmra.mxu0 %vm97_vm0, %v32_v21  ;;  %v45_v21 = vld [vmem:[%s663_s3 + $0x10] sm:$0xff] }
  0x1b   :  { %222 = vmatprep.mubr.f32.mxu0 %v502_v3 }
  0x1e   :  { %490 = vmatmul.mubr.msk.f32.gmra.mxu0 %vm97_vm0, %v33_v24 }
  0x1f   :  { %228 = vmatprep.mubr.f32.mxu0 %v502_v3 }
  0x22   :  { %491 = vmatmul.mubr.msk.f32.gmra.mxu0 %vm97_vm0, %v34_v25 }
  0x7f   :  { %v85_v39 = vpop.permute.xlu1 %84 }
  0x80   :  { %v95_v37 = vpop.permute.xlu0 %94 }
  0x83   :  { %v80_v44 = vpop.permute.xlu1 %79 }
  0x84   :  { %v90_v42 = vpop.permute.xlu0 %89 }
  0x87   :  { %v70_v55 = vpop.permute.xlu1 %69 }
  0x88   :  { %v75_v50 = vpop.permute.xlu0 %74 }
  0x8b   :  { %v60_v6 = vpop.permute.xlu1 %59 }
  0x8c   :  { %v65_v0 = vpop.permute.xlu0 %64 }
  0xc6   :  { %v188_v26 = vpop.f32.mrf.mxu0 }
  0xc7   :  { %v189_v13 = vadd.f32 %v188_v26, %v60_v6 }
  0xc8   :  { %v190_v27 = vpop.f32.mrf.mxu0 }
  0xc9   :  { %v191_v11 = vadd.f32 %v190_v27, %v60_v6  ;;  %v235_v18 = vmax.f32 %v189_v13, 0.0 }
  0xca   :  { %v194_v28 = vpop.f32.mrf.mxu0 }
  0xcb   :  { %v195_v9 = vadd.f32 %v194_v28, %v65_v0  ;;  %v236_v17 = vmax.f32 %v191_v11, 0.0  ;;  %v269_v28 = vpop.permute.xlu0 %268 }
  0xcc   :  { %v196_v29 = vpop.f32.mrf.mxu0 }
  0xcd   :  { %v197_v7 = vadd.f32 %v196_v29, %v65_v0  ;;  %v237_v16 = vmax.f32 %v195_v9, 0.0 }
  0xce   :  { %v200_v30 = vpop.f32.mrf.mxu0 }
  0xcf   :  { %v201_v4 = vadd.f32 %v200_v30, %v70_v55  ;;  %v238_v15 = vmax.f32 %v197_v7, 0.0  ;;  %v264_v30 = vpop.permute.xlu1 %263 }
  0xd0   :  { %v202_v31 = vpop.f32.mrf.mxu0 }
  0xd1   :  { %v203_v1 = vadd.f32 %v202_v31, %v70_v55  ;;  %v239_v14 = vmax.f32 %v201_v4, 0.0 }
  0xd2   :  { %v206_v32 = vpop.f32.mrf.mxu0 }
  0xd3   :  { %v207_v62 = vadd.f32 %v206_v32, %v75_v50  ;;  %v240_v12 = vmax.f32 %v203_v1, 0.0 }
  0xd4   :  { %v208_v33 = vpop.f32.mrf.mxu0 }
  0xd5   :  { %v209_v60 = vadd.f32 %v208_v33, %v75_v50  ;;  %v241_v10 = vmax.f32 %v207_v62, 0.0  ;;  %v51_v50 = vld [vmem:[%s664_s5] sm:$0x1] }
  0xd6   :  { %v212_v34 = vpop.f32.mrf.mxu0 }
  0xd7   :  { %v213_v58 = vadd.f32 %v212_v34, %v80_v44  ;;  %v242_v8 = vmax.f32 %v209_v60, 0.0 }
  0xd8   :  { %v214_v35 = vpop.f32.mrf.mxu0 }
  0xd9   :  { %v215_v56 = vadd.f32 %v214_v35, %v80_v44  ;;  %v243_v5 = vmax.f32 %v213_v58, 0.0 }
  0xda   :  { %v218_v36 = vpop.f32.mrf.mxu0 }
  0xdb   :  { %v219_v53 = vadd.f32 %v218_v36, %v85_v39  ;;  %v244_v2 = vmax.f32 %v215_v56, 0.0  ;;  %v259_v36 = vpop.permute.xlu0 %258  ;;  %v381_v56 = vstv %s665_s6 }
  0xdc   :  { %v220_v38 = vpop.f32.mrf.mxu0 }
  0xdd   :  { %v221_v51 = vadd.f32 %v220_v38, %v85_v39  ;;  %v245_v63 = vmax.f32 %v219_v53, 0.0  ;;  %v463_v53 = vlaneseq }
  0xde   :  { %v224_v40 = vpop.f32.mrf.mxu0 }
  0xdf   :  { %v225_v49 = vadd.f32 %v224_v40, %v90_v42  ;;  %v246_v61 = vmax.f32 %v221_v51, 0.0  ;;  %v254_v40 = vpop.permute.xlu1 %253  ;;  %v504_v51 = vmov 1966171168   ;;  %v464_v55 = vshrl.u32 %v463_v53, 7 }
  0xe0   :  { %v226_v41 = vpop.f32.mrf.mxu0  ;;  %vm477_vm3 = vcmp.lt.s32.totalorder %v463_v53, 256 }
  0xe1   :  { %v227_v47 = vadd.f32 %v226_v41, %v90_v42  ;;  %v247_v59 = vmax.f32 %v225_v49, 0.0 }
  0xe2   :  { %v230_v43 = vpop.f32.mrf.mxu0 }
  0xe3   :  { %v231_v45 = vadd.f32 %v230_v43, %v95_v37  ;;  %v248_v57 = vmax.f32 %v227_v47, 0.0 }
  0xe4   :  { %v232_v46 = vpop.f32.mrf.mxu0 }
  0xe5   :  { %v233_v48 = vadd.f32 %v232_v46, %v95_v37  ;;  %v249_v54 = vmax.f32 %v231_v45, 0.0 }
  0xe7   :  { %v250_v52 = vmax.f32 %v233_v48, 0.0 }
  0xe9   :  { %300 = vmatprep.subr.mxu1 %v250_v52  ;;  %v461_v52 = vunpack.c.l.s4 %v504_v51 }
  0xea   :  { %301 = vmatpush1.msra.mxu1 %v249_v54 }
  0xeb   :  { %302 = vmatprep.subr.mxu1 %v248_v57  ;;  %v462_v54 = vunpack.c.0.s8 %v461_v52 }
  0xec   :  { %303 = vmatpush1.msra.mxu1 %v247_v59 }
  0xed   :  { %304 = vmatprep.subr.mxu1 %v246_v61  ;;  %v465_v61 = vsub.s32 %v462_v54, %v464_v55 }
  0xee   :  { %305 = vmatpush1.msra.mxu1 %v245_v63 }
  0xef   :  { %306 = vmatprep.subr.mxu1 %v244_v2 }
  0xf0   :  { %307 = vmatpush1.msra.mxu1 %v243_v5 }
  0xf1   :  { %308 = vmatprep.subr.mxu1 %v242_v8 }
  0xf2   :  { %309 = vmatpush1.msra.mxu1 %v241_v10 }
  0xf3   :  { %310 = vmatprep.subr.mxu1 %v240_v12 }
  0xf4   :  { %311 = vmatpush1.msra.mxu1 %v239_v14 }
  0xf5   :  { %312 = vmatprep.subr.mxu1 %v238_v15 }
  0xf6   :  { %313 = vmatpush1.msra.mxu1 %v237_v16 }
  0xf7   :  { %314 = vmatprep.subr.mxu1 %v236_v17 }
  0xf8   :  { %315 = vmatpush1.msra.mxu1 %v235_v18 }
  0xf9   :  { %492 = vmatmul.mubr.msk.f32.vlgmr.msra.gmra.mxu1 %vm271_vm1, %v43_v19 }
  0xfa   :  { %354 = vmatprep.mubr.f32.mxu1 %v502_v3 }
  0xfd   :  { %493 = vmatmul.mubr.msk.f32.gmra.mxu1 %vm271_vm1, %v44_v20 }
  0xfe   :  { %360 = vmatprep.mubr.f32.mxu1 %v502_v3 }
 0x101   :  { %494 = vmatmul.mubr.msk.f32.gmra.mxu1 %vm271_vm1, %v45_v21 }
 0x102   :  { %366 = vmatprep.mubr.f32.mxu1 %v502_v3 }
 0x105   :  { %495 = vmatmul.mubr.msk.f32.gmra.mxu1 %vm271_vm1, %v46_v22 }
 0x106   :  { %450 = vmatprep.mubr.f32.mxu1 %v502_v3 }
 0x1b9   :  { %v350_v23 = vpop.f32.mrf.mxu1 }
 0x1ba   :  { %v351_v44 = vadd.f32 %v350_v23, %v254_v40 }
 0x1bb   :  { %v352_v24 = vpop.f32.mrf.mxu1 }
 0x1bc   :  { %v353_v42 = vadd.f32 %v352_v24, %v254_v40  ;;  %v373_v49 = vmax.f32 %v351_v44, 0.0 }
 0x1bd   :  { %v356_v25 = vpop.f32.mrf.mxu1 }
 0x1be   :  { %v357_v41 = vadd.f32 %v356_v25, %v259_v36  ;;  %v374_v48 = vmax.f32 %v353_v42, 0.0 }
 0x1bf   :  { %v358_v26 = vpop.f32.mrf.mxu1 }
 0x1c0   :  { %v359_v38 = vadd.f32 %v358_v26, %v259_v36  ;;  %v375_v47 = vmax.f32 %v357_v41, 0.0 }
 0x1c1   :  { %v362_v27 = vpop.f32.mrf.mxu1 }
 0x1c2   :  { %v363_v37 = vadd.f32 %v362_v27, %v264_v30  ;;  %v376_v46 = vmax.f32 %v359_v38, 0.0 }
 0x1c3   :  { %v364_v29 = vpop.f32.mrf.mxu1 }
 0x1c4   :  { %v365_v34 = vadd.f32 %v364_v29, %v264_v30  ;;  %v377_v45 = vmax.f32 %v363_v37, 0.0 }
 0x1c5   :  { %v368_v31 = vpop.f32.mrf.mxu1 }
 0x1c6   :  { %v369_v32 = vadd.f32 %v368_v31, %v269_v28  ;;  %v378_v43 = vmax.f32 %v365_v34, 0.0 }
 0x1c7   :  { %v370_v33 = vpop.f32.mrf.mxu1 }
 0x1c8   :  { %v371_v35 = vadd.f32 %v370_v33, %v269_v28  ;;  %v379_v3 = vmax.f32 %v369_v32, 0.0 }
 0x1ca   :  { %v380_v39 = vmax.f32 %v371_v35, 0.0 }
 0x1cc   :  { %410 = vmatprep.subr.mxu1 %v380_v39 }
 0x1cd   :  { %411 = vmatpush1.msra.mxu1 %v379_v3 }
 0x1ce   :  { %412 = vmatprep.subr.mxu1 %v378_v43 }
 0x1cf   :  { %413 = vmatpush1.msra.mxu1 %v377_v45 }
 0x1d0   :  { %414 = vmatprep.subr.mxu1 %v376_v46 }
 0x1d1   :  { %415 = vmatpush1.msra.mxu1 %v375_v47 }
 0x1d2   :  { %416 = vmatprep.subr.mxu1 %v374_v48 }
 0x1d3   :  { %417 = vmatpush1.msra.mxu1 %v373_v49 }
 0x1d4   :  { %496 = vmatmul.mubr.msk.f32.vlgmr.msra.gmra.mxu1 %vm382_vm2, %v51_v50 }
 0x294   :  { %v452_v57 = vpop.f32.mrf.mxu1 }
 0x295   :  { %v453_v59 = vadd.f32 %v452_v57, %v381_v56 }
 0x296   :  { %v454_v58 = vpop.f32.mrf.mxu1 }
 0x297   :  { %v455_v60 = vadd.f32 %v454_v58, %v381_v56 }
 0x299   :  { %v459_v62 = vcombine.low %v453_v59, %v455_v60 }
 0x29b   :  { %v466_v63 = vrot.slane %v459_v62, %v465_v61 }
 0x29d   :  { %v473_v0 = vrot.slane %v466_v63, %v465_v61 }
 0x29f   :  { %479 = vst.msk [vmem:[%s666_s7] sm:$0x3] %vm477_vm3, %v473_v0 }

</bundles_post_ra>
